<compile_context>
chip_gen: v6e
topology: v6e:2x2x1
jax: 0.10.0
libtpu: 0.0.40
codegen_flags: <defaults>
</compile_context>

<pallas_src>
import functools

import jax
import jax.numpy as jnp
from jax.experimental import pallas as pl
from jax.experimental.pallas import tpu as pltpu

_LANE = 128
_SUBLANE = 8


def _round_up(x: int, m: int) -> int:
    return (x + m - 1) // m * m


def qnetwork_kernel(x_ref, w1_ref, b1_ref, w2_ref, b2_ref, o_ref):
    # y = relu(x @ W1 + b1) @ W2 + b2, entirely in VMEM.
    x = x_ref[...]
    h = jnp.dot(x, w1_ref[...], preferred_element_type=jnp.float32)
    h = jnp.maximum(h + b1_ref[...], 0.0)                  # bias + ReLU (VPU, f32)
    y = jnp.dot(h.astype(w2_ref.dtype), w2_ref[...],
                preferred_element_type=jnp.float32)
    o_ref[...] = (y + b2_ref[...]).astype(o_ref.dtype)


@functools.partial(jax.jit, static_argnames=("tile_b", "compute_dtype"))
def qnetwork_forward(x, w1, b1, w2, b2, *, tile_b: int = 256,
                     compute_dtype=jnp.float32):
    """x: (B, in); w1: (in, hidden); b1: (1, hidden); w2: (hidden, out);
    b2: (1, out).  Returns (B, out) in float32.  Matches
    relu(x @ w1 + b1) @ w2 + b2 (PyTorch nn.Linear semantics with transposed
    weights)."""
    B, K = x.shape
    H = w1.shape[1]
    O = w2.shape[1]

    # Lane-dense padding of hidden / output feature dims (zeros -> exact math).
    H_pad = _round_up(H, _LANE)
    O_pad = _round_up(O, _LANE)
    w1p = jnp.pad(w1, ((0, 0), (0, H_pad - H))).astype(compute_dtype)
    b1p = jnp.pad(b1, ((0, 0), (0, H_pad - H))).astype(jnp.float32)
    w2p = jnp.pad(w2, ((0, H_pad - H), (0, O_pad - O))).astype(compute_dtype)
    b2p = jnp.pad(b2, ((0, 0), (0, O_pad - O))).astype(jnp.float32)

    # Batch tiling: sublane-aligned tile, batch padded up to a whole number of
    # tiles.  tile_b=256 keeps the double-buffered x/out blocks small (well
    # under 1 MiB even with the lane-padded output), far inside v7x's 64 MiB
    # VMEM, while amortizing the ~0.35 us/step grid overhead.
    tb = min(tile_b, _round_up(B, _SUBLANE))
    B_pad = _round_up(B, tb)
    xp = jnp.pad(x, ((0, B_pad - B), (0, 0))).astype(compute_dtype)

    grid = (B_pad // tb,)
    out = pl.pallas_call(
        qnetwork_kernel,
        out_shape=jax.ShapeDtypeStruct((B_pad, O_pad), jnp.float32),
        grid=grid,
        in_specs=[
            # x: tiled over batch only; full (small) feature dim per block.
            pl.BlockSpec((tb, K), lambda i: (i, 0)),
            # Weights/biases: full blocks, index_map ignores the batch index ->
            # DMA'd once, VMEM-resident across all batch tiles.
            pl.BlockSpec((K, H_pad), lambda i: (0, 0)),
            pl.BlockSpec((1, H_pad), lambda i: (0, 0)),
            pl.BlockSpec((H_pad, O_pad), lambda i: (0, 0)),
            pl.BlockSpec((1, O_pad), lambda i: (0, 0)),
        ],
        out_specs=pl.BlockSpec((tb, O_pad), lambda i: (i, 0)),
        compiler_params=pltpu.CompilerParams(
            dimension_semantics=("parallel",)),
    )(xp, w1p, b1p, w2p, b2p)

    return out[:B, :O]


def init_params(key, input_size, hidden_size, output_size):
    # Deterministic init mimicking nn.Linear's uniform(-1/sqrt(fan_in), ...).
    k1, k2, k3, k4 = jax.random.split(key, 4)
    bound1 = 1.0 / jnp.sqrt(input_size)
    bound2 = 1.0 / jnp.sqrt(hidden_size)
    w1 = jax.random.uniform(k1, (input_size, hidden_size), jnp.float32, -bound1, bound1)
    b1 = jax.random.uniform(k2, (1, hidden_size), jnp.float32, -bound1, bound1)
    w2 = jax.random.uniform(k3, (hidden_size, output_size), jnp.float32, -bound2, bound2)
    b2 = jax.random.uniform(k4, (1, output_size), jnp.float32, -bound2, bound2)
    return w1, b1, w2, b2


if __name__ == "__main__":
    input_size, hidden_size, output_size = 16, 32, 4
    batch = 8

    key = jax.random.PRNGKey(0)
    kx, kp = jax.random.split(key)
    x = jax.random.normal(kx, (batch, input_size), jnp.float32)
    w1, b1, w2, b2 = init_params(kp, input_size, hidden_size, output_size)

    out = qnetwork_forward(x, w1, b1, w2, b2)
    jax.block_until_ready(out)

    # Reference in plain JAX (same semantics as the PyTorch forward).
    ref = jnp.maximum(x @ w1 + b1, 0.0) @ w2 + b2
    assert out.shape == (batch, output_size)
    assert jnp.allclose(out, ref, atol=1e-5, rtol=1e-5)

    # Also exercise a batch that is not a tile multiple (padding path) and the
    # bf16 compute path used on v6e/v7x (looser tolerance: bf16 inputs).
    xb = jax.random.normal(kx, (37, input_size), jnp.float32)
    out_pad = qnetwork_forward(xb, w1, b1, w2, b2)
    jax.block_until_ready(out_pad)
    ref_pad = jnp.maximum(xb @ w1 + b1, 0.0) @ w2 + b2
    assert out_pad.shape == (37, output_size)
    assert jnp.allclose(out_pad, ref_pad, atol=1e-5, rtol=1e-5)

    out_bf16 = qnetwork_forward(xb, w1, b1, w2, b2, compute_dtype=jnp.bfloat16)
    jax.block_until_ready(out_bf16)
    assert jnp.allclose(out_bf16, ref_pad, atol=5e-2, rtol=5e-2)

    print("KERNEL_OK")
</pallas_src>

<mosaic_0001>
module attributes {stable_mosaic.version = 11 : i64} {
  func.func @qnetwork_kernel(%arg0: i32, %arg1: memref<8x16xf32, #tpu.memory_space<vmem>>, %arg2: memref<16x128xf32, #tpu.memory_space<vmem>>, %arg3: memref<1x128xf32, #tpu.memory_space<vmem>>, %arg4: memref<128x128xf32, #tpu.memory_space<vmem>>, %arg5: memref<1x128xf32, #tpu.memory_space<vmem>>, %arg6: memref<8x128xf32, #tpu.memory_space<vmem>>) attributes {dimension_semantics = [#tpu.dimension_semantics<parallel>], iteration_bounds = array<i64: 1>, scalar_prefetch = 0 : i64, scratch_operands = 0 : i64, tpu.core_type = #tpu.core_type<tc>, window_params = [{transform_indices = @transform_0, window_bounds = array<i64: 8, 16>}, {pipeline_mode = #tpu.pipeline_mode<synchronous>, transform_indices = @transform_1, window_bounds = array<i64: 16, 128>}, {pipeline_mode = #tpu.pipeline_mode<synchronous>, transform_indices = @transform_2, window_bounds = array<i64: 1, 128>}, {pipeline_mode = #tpu.pipeline_mode<synchronous>, transform_indices = @transform_3, window_bounds = array<i64: 128, 128>}, {pipeline_mode = #tpu.pipeline_mode<synchronous>, transform_indices = @transform_4, window_bounds = array<i64: 1, 128>}, {transform_indices = @transform_5, window_bounds = array<i64: 8, 128>}]} {
    %c0 = arith.constant 0 : index
    %c0_0 = arith.constant 0 : index
    %0 = vector.load %arg1[%c0, %c0_0] : memref<8x16xf32, #tpu.memory_space<vmem>>, vector<8x16xf32>
    %c0_1 = arith.constant 0 : index
    %c0_2 = arith.constant 0 : index
    %1 = vector.load %arg2[%c0_1, %c0_2] : memref<16x128xf32, #tpu.memory_space<vmem>>, vector<16x128xf32>
    %cst = arith.constant dense<0.000000e+00> : vector<8x128xf32>
    %2 = tpu.matmul %0, %1, %cst {dimension_numbers = #tpu.dot_dimension_numbers<[1], [0], [0], [1], [0, 0, 1, 1], [], []>} : vector<8x16xf32>, vector<16x128xf32>, vector<8x128xf32> -> vector<8x128xf32>
    %c0_3 = arith.constant 0 : index
    %c0_4 = arith.constant 0 : index
    %3 = vector.load %arg3[%c0_3, %c0_4] : memref<1x128xf32, #tpu.memory_space<vmem>>, vector<1x128xf32>
    %4 = vector.broadcast %3 : vector<1x128xf32> to vector<8x128xf32>
    %5 = arith.addf %2, %4 : vector<8x128xf32>
    %cst_5 = arith.constant 0.000000e+00 : f32
    %6 = vector.broadcast %cst_5 : f32 to vector<8x128xf32>
    %7 = arith.maximumf %5, %6 : vector<8x128xf32>
    %c0_6 = arith.constant 0 : index
    %c0_7 = arith.constant 0 : index
    %8 = vector.load %arg4[%c0_6, %c0_7] : memref<128x128xf32, #tpu.memory_space<vmem>>, vector<128x128xf32>
    %cst_8 = arith.constant dense<0.000000e+00> : vector<8x128xf32>
    %9 = tpu.matmul %7, %8, %cst_8 {dimension_numbers = #tpu.dot_dimension_numbers<[1], [0], [0], [1], [0, 0, 1, 1], [], []>} : vector<8x128xf32>, vector<128x128xf32>, vector<8x128xf32> -> vector<8x128xf32>
    %c0_9 = arith.constant 0 : index
    %c0_10 = arith.constant 0 : index
    %10 = vector.load %arg5[%c0_9, %c0_10] : memref<1x128xf32, #tpu.memory_space<vmem>>, vector<1x128xf32>
    %11 = vector.broadcast %10 : vector<1x128xf32> to vector<8x128xf32>
    %12 = arith.addf %9, %11 : vector<8x128xf32>
    %c0_11 = arith.constant 0 : index
    %c0_12 = arith.constant 0 : index
    %13 = vector.load %arg6[%c0_11, %c0_12] : memref<8x128xf32, #tpu.memory_space<vmem>>, vector<8x128xf32>
    tpu.vector_store %arg6[%c0_11, %c0_12], %12 {strides = array<i32>} : memref<8x128xf32, #tpu.memory_space<vmem>>, vector<8x128xf32>,
    return
  }
  func.func @transform_0(%arg0: i32) -> (i32, i32) {
    %c0_i32 = arith.constant 0 : i32
    %c0_i32_0 = arith.constant 0 : i32
    return %arg0, %c0_i32 : i32, i32
  }
  func.func @transform_1(%arg0: i32) -> (i32, i32) {
    %c0_i32 = arith.constant 0 : i32
    %c0_i32_0 = arith.constant 0 : i32
    %c0_i32_1 = arith.constant 0 : i32
    return %c0_i32, %c0_i32_0 : i32, i32
  }
  func.func @transform_2(%arg0: i32) -> (i32, i32) {
    %c0_i32 = arith.constant 0 : i32
    %c0_i32_0 = arith.constant 0 : i32
    %c0_i32_1 = arith.constant 0 : i32
    return %c0_i32, %c0_i32_0 : i32, i32
  }
  func.func @transform_3(%arg0: i32) -> (i32, i32) {
    %c0_i32 = arith.constant 0 : i32
    %c0_i32_0 = arith.constant 0 : i32
    %c0_i32_1 = arith.constant 0 : i32
    return %c0_i32, %c0_i32_0 : i32, i32
  }
  func.func @transform_4(%arg0: i32) -> (i32, i32) {
    %c0_i32 = arith.constant 0 : i32
    %c0_i32_0 = arith.constant 0 : i32
    %c0_i32_1 = arith.constant 0 : i32
    return %c0_i32, %c0_i32_0 : i32, i32
  }
  func.func @transform_5(%arg0: i32) -> (i32, i32) {
    %c0_i32 = arith.constant 0 : i32
    %c0_i32_0 = arith.constant 0 : i32
    return %arg0, %c0_i32 : i32, i32
  }
}

</mosaic_0001>

<bundles_post_ra>
// kernel: qnetwork_forward.1
= control target key start
LH: loop header
LB: loop body
LE: loop exit
PB: predicated region body
PF: predicated region fallthrough
CT: control target
= control target key end

     0   :  { %v270_v0 = vmov 0.0   ;;  %vm271_vm0 = vmmov 0   ;;  %vm30_vm1 = vcmask 130048   ;;  %s370_s1 = inlined_call_operand.vmem [shape: f32[16,128], index: 1, kind: input, shape index: {}]   ;;  %s371_s0 = inlined_call_operand.vmem [shape: f32[8,16], index: 0, kind: input, shape index: {}]   ;;  %s372_s3 = inlined_call_operand.vmem [shape: f32[128,128], index: 3, kind: input, shape index: {}]   ;;  %s373_s2 = inlined_call_operand.vmem [shape: f32[1,128], index: 2, kind: input, shape index: {}]   ;;  %s374_s4 = inlined_call_operand.vmem [shape: f32[1,128], index: 4, kind: input, shape index: {}]   ;;  %s375_s5 = inlined_call_operand.vmem [shape: f32[8,128], index: 5, kind: output, shape index: {}]  }
   0x1   :  { %226 = vmatprep.subr.mxu0 %v270_v0  ;;  %v22_v1 = vld [vmem:[%s370_s1 + $0x8] sm:$0xff]  ;;  %v21_v2 = vld [vmem:[%s370_s1] sm:$0xff]  ;;  %230 = vmatprep.mubr.msk.f32.mxu0 %vm271_vm0, %v270_v0  ;;  %v120_v4 = vld [vmem:[%s372_s3 + $0x78] sm:$0xff] }
   0x2   :  { %227 = vmatpush3.msra.mxu0 %v22_v1  ;;  %v20_v3 = vld [vmem:[%s371_s0] sm:$0xff]  ;;  %233 = vmatprep.subr.mxu1 %v270_v0  ;;  %v119_v5 = vld [vmem:[%s372_s3 + $0x70] sm:$0xff]  ;;  %v118_v6 = vld [vmem:[%s372_s3 + $0x68] sm:$0xff] }
   0x3   :  { %228 = vmatprep.subr.mxu0 %v270_v0  ;;  %234 = vmatpush3.msra.mxu1 %v120_v4  ;;  %v117_v7 = vld [vmem:[%s372_s3 + $0x60] sm:$0xff]  ;;  %v116_v8 = vld [vmem:[%s372_s3 + $0x58] sm:$0xff]  ;;  %v115_v9 = vld [vmem:[%s372_s3 + $0x50] sm:$0xff] }
   0x4   :  { %229 = vmatpush3.msra.mxu0 %v21_v2  ;;  %235 = vmatprep.subr.mxu1 %v270_v0  ;;  %v114_v10 = vld [vmem:[%s372_s3 + $0x48] sm:$0xff]  ;;  %v113_v11 = vld [vmem:[%s372_s3 + $0x40] sm:$0xff]  ;;  %v112_v12 = vld [vmem:[%s372_s3 + $0x38] sm:$0xff] }
   0x5   :  { %231 = vmatmul.mubr.msk.f32.vlgmr.msra.gmra.mxu0 %vm30_vm1, %v20_v3  ;;  %236 = vmatpush3.msra.mxu1 %v119_v5  ;;  %v111_v13 = vld [vmem:[%s372_s3 + $0x30] sm:$0xff]  ;;  %v110_v14 = vld [vmem:[%s372_s3 + $0x28] sm:$0xff]  ;;  %v109_v15 = vld [vmem:[%s372_s3 + $0x20] sm:$0xff] }
   0x6   :  { %237 = vmatprep.subr.mxu1 %v270_v0  ;;  %265 = vmatprep.mubr.msk.f32.mxu1 %vm271_vm0, %v270_v0  ;;  %v108_v16 = vld [vmem:[%s372_s3 + $0x18] sm:$0xff]  ;;  %v107_v17 = vld [vmem:[%s372_s3 + $0x10] sm:$0xff]  ;;  %v106_v18 = vld [vmem:[%s372_s3 + $0x8] sm:$0xff] }
   0x7   :  { %238 = vmatpush3.msra.mxu1 %v118_v6  ;;  %v105_v19 = vld [vmem:[%s372_s3] sm:$0xff] }
   0x8   :  { %239 = vmatprep.subr.mxu1 %v270_v0  ;;  %v203_v20 = vld [vmem:[%s373_s2] ss:$0 sm:$0xff] }
   0x9   :  { %240 = vmatpush3.msra.mxu1 %v117_v7  ;;  %v205_v25 = vld [vmem:[%s374_s4] ss:$0 sm:$0xff] }
   0xa   :  { %241 = vmatprep.subr.mxu1 %v270_v0 }
   0xb   :  { %242 = vmatpush3.msra.mxu1 %v116_v8 }
   0xc   :  { %243 = vmatprep.subr.mxu1 %v270_v0 }
   0xd   :  { %244 = vmatpush3.msra.mxu1 %v115_v9 }
   0xe   :  { %245 = vmatprep.subr.mxu1 %v270_v0 }
   0xf   :  { %246 = vmatpush3.msra.mxu1 %v114_v10 }
  0x10   :  { %247 = vmatprep.subr.mxu1 %v270_v0 }
  0x11   :  { %248 = vmatpush3.msra.mxu1 %v113_v11 }
  0x12   :  { %249 = vmatprep.subr.mxu1 %v270_v0 }
  0x13   :  { %250 = vmatpush3.msra.mxu1 %v112_v12 }
  0x14   :  { %251 = vmatprep.subr.mxu1 %v270_v0 }
  0x15   :  { %252 = vmatpush3.msra.mxu1 %v111_v13 }
  0x16   :  { %253 = vmatprep.subr.mxu1 %v270_v0 }
  0x17   :  { %254 = vmatpush3.msra.mxu1 %v110_v14 }
  0x18   :  { %255 = vmatprep.subr.mxu1 %v270_v0 }
  0x19   :  { %256 = vmatpush3.msra.mxu1 %v109_v15 }
  0x1a   :  { %257 = vmatprep.subr.mxu1 %v270_v0 }
  0x1b   :  { %258 = vmatpush3.msra.mxu1 %v108_v16 }
  0x1c   :  { %259 = vmatprep.subr.mxu1 %v270_v0 }
  0x1d   :  { %260 = vmatpush3.msra.mxu1 %v107_v17 }
  0x1e   :  { %261 = vmatprep.subr.mxu1 %v270_v0 }
  0x1f   :  { %262 = vmatpush3.msra.mxu1 %v106_v18 }
  0x20   :  { %263 = vmatprep.subr.mxu1 %v270_v0 }
  0x21   :  { %264 = vmatpush3.msra.mxu1 %v105_v19 }
  0xc5   :  { %v100_v21 = vpop.f32.mrf.mxu0 }
  0xc6   :  { %v101_v22 = vadd.f32 %v203_v20, %v100_v21 }
  0xc7   :  { %v232_v23 = vpop.f32.mrf.mxu0 }
  0xc8   :  { %v104_v24 = vmax.f32 %v101_v22, 0.0 }
  0xca   :  { %266 = vmatmul.mubr.f32.vlgmr.msra.gmra.mxu1 %v104_v24 }
 0x18a   :  { %v194_v26 = vpop.f32.mrf.mxu1 }
 0x18b   :  { %v195_v27 = vadd.f32 %v205_v25, %v194_v26 }
 0x18c   :  { %v267_v28 = vpop.f32.mrf.mxu1 }
 0x18d   :  { %198 = vst [vmem:[%s375_s5] sm:$0xff] %v195_v27 }

</bundles_post_ra>
